<compile_context>
chip_gen: v6e
topology: v6e:2x2x1
jax: 0.10.0
libtpu: 0.0.40
codegen_flags: <defaults>
</compile_context>

<pallas_src>
import functools

import jax
import jax.numpy as jnp
from jax import lax
from jax.experimental import pallas as pl
from jax.experimental.pallas import tpu as pltpu


def _round_up(n, m):
    return ((n + m - 1) // m) * m


def _cdiv(a, b):
    return -(-a // b)


def _mlp_kernel(x_ref, w_first_ref, b_first_ref, w_mid_ref, b_mid_ref,
                w_last_ref, b_last_ref, out_ref, *, num_mid):
    """Fused MLP; the whole layer stack stays in vregs/VMEM.

    x_ref:      (tile_b, D)      input rows (D unpadded)
    w_first:    (D, Hp)          first Linear, transposed + H padded to Hp
    b_first:    (1, Hp)
    w_mid:      (nm, Hp, Hp)     stacked hidden Linears (transposed, padded)
    b_mid:      (nm, 1, Hp)
    w_last:     (8, Hp)          head weight in row 0, rows 1..7 zero (sublane pad)
    b_last:     (1, 1)
    out_ref:    (1, tile_b)      lane-dense head output (batch along lanes)
    """
    h = jnp.maximum(
        jnp.dot(x_ref[...], w_first_ref[...],
                preferred_element_type=jnp.float32) + b_first_ref[...],
        0.0)
    for k in range(num_mid):  # small static trip count (4) -> unrolled
        h = jnp.maximum(
            jnp.dot(h, w_mid_ref[k],
                    preferred_element_type=jnp.float32) + b_mid_ref[k],
            0.0)
    # Head computed "transposed" so the per-row scalar lands on lanes:
    #   outT[m, i] = sum_j w_last[m, j] * h[i, j]
    # (NT dot_general: contract last dims of both operands — same pattern as
    # the flash-attention q @ k^T matmul, lowers natively on the MXU.)
    outT = lax.dot_general(
        w_last_ref[...], h,
        dimension_numbers=(((1,), (1,)), ((), ())),
        preferred_element_type=jnp.float32)          # (8, tile_b)
    out_ref[...] = outT[0:1, :] + b_last_ref[...]    # (1, tile_b), lane-dense


def pack_params(params):
    """Pack PyTorch-layout (out,in) weights into TPU-friendly tensors.

    Call ONCE per parameter set; the result is reused by every forward.
    `params` is a list of (W, b) per Linear layer, in order.
    """
    f32 = jnp.float32
    (w0, b0) = params[0]
    mids = params[1:-1]
    (wl, bl) = params[-1]

    D, H, O = w0.shape[1], w0.shape[0], wl.shape[0]
    assert O == 1, "meta_NN head is Linear(16, 1)"
    Hp = _round_up(H, 128)

    # First layer: (D, Hp) — D left unpadded (review item 1).
    w_first = jnp.zeros((D, Hp), f32).at[:, :H].set(jnp.asarray(w0, f32).T)
    b_first = jnp.zeros((1, Hp), f32).at[0, :H].set(jnp.asarray(b0, f32))

    nm = len(mids)
    w_mid = jnp.zeros((max(nm, 1), Hp, Hp), f32)
    b_mid = jnp.zeros((max(nm, 1), 1, Hp), f32)
    for k, (w, b) in enumerate(mids):
        w_mid = w_mid.at[k, :H, :H].set(jnp.asarray(w, f32).T)
        b_mid = b_mid.at[k, 0, :H].set(jnp.asarray(b, f32))

    # Head weight as an (8, Hp) row block (row 0 real) -> sublane-aligned M for
    # the NT matmul; padded rows/cols are zero so results are exact.
    w_last = jnp.zeros((8, Hp), f32).at[0, :H].set(jnp.asarray(wl, f32)[0])
    b_last = jnp.asarray(bl, f32).reshape(1, 1)

    return {"w_first": w_first, "b_first": b_first,
            "w_mid": w_mid, "b_mid": b_mid,
            "w_last": w_last, "b_last": b_last,
            "meta": (D, H, nm)}


_MAX_TILE_B = 2048  # per-step VMEM stays well under scoped defaults (v5e 16 MiB)


def meta_nn_forward(x, packed):
    """x: (B, input_size) float array. Returns (B, 1) float32."""
    x = jnp.asarray(x).astype(jnp.float32)
    D, H, nm = packed["meta"]
    B = x.shape[0]
    Hp = packed["w_first"].shape[1]
    nm_buf = packed["w_mid"].shape[0]

    # Batch tiling: tiles are multiples of 128 once B >= 128 (lane-dense,
    # unmasked output stores), else multiples of 8.  For large batches use at
    # least 2 grid steps so v7x's 2 TensorCores both get work; tile size is
    # adaptive so over-padding stays < one granule per tile.
    gran = 128 if B >= 128 else 8
    ntiles = 1 if B <= _MAX_TILE_B else max(2, _cdiv(B, _MAX_TILE_B))
    tile_b = _round_up(_cdiv(B, ntiles), gran)
    Bp = ntiles * tile_b

    x_p = x if Bp == B else jnp.zeros((Bp, D), jnp.float32).at[:B, :].set(x)

    kernel = functools.partial(_mlp_kernel, num_mid=nm)

    out_p = pl.pallas_call(
        kernel,
        out_shape=jax.ShapeDtypeStruct((1, Bp), jnp.float32),
        grid=(ntiles,),
        in_specs=[
            pl.BlockSpec((tile_b, D), lambda i: (i, 0)),          # x tile
            pl.BlockSpec((D, Hp), lambda i: (0, 0)),              # w_first (resident)
            pl.BlockSpec((1, Hp), lambda i: (0, 0)),              # b_first
            pl.BlockSpec((nm_buf, Hp, Hp), lambda i: (0, 0, 0)),  # w_mid
            pl.BlockSpec((nm_buf, 1, Hp), lambda i: (0, 0, 0)),   # b_mid
            pl.BlockSpec((8, Hp), lambda i: (0, 0)),              # w_last
            pl.BlockSpec((1, 1), lambda i: (0, 0)),               # b_last
        ],
        out_specs=pl.BlockSpec((1, tile_b), lambda i: (0, i)),    # lane-dense row
        compiler_params=pltpu.CompilerParams(
            dimension_semantics=("parallel",)),
    )(x_p, packed["w_first"], packed["b_first"], packed["w_mid"],
      packed["b_mid"], packed["w_last"], packed["b_last"])

    # Contiguous reshape + slice (no strided pass over a padded buffer).
    return out_p.reshape(Bp)[:B].reshape(B, 1)


def _reference_forward(x, params):
    """Pure-JAX reference matching meta_NN.forward."""
    hp = jax.lax.Precision.HIGHEST
    h = jnp.asarray(x).astype(jnp.float32)
    for (W, b) in params[:-1]:
        h = jnp.maximum(jnp.dot(h, W.T, precision=hp) + b, 0.0)
    W, b = params[-1]
    return jnp.dot(h, W.T, precision=hp) + b


if __name__ == "__main__":
    layer_num = 5
    input_size = 10
    hidden = 16
    batch = 2

    # Parameters with PyTorch nn.Linear default init U(-1/sqrt(fan_in), +).
    dims = [input_size] + [hidden] * layer_num + [1]
    key = jax.random.PRNGKey(0)
    params = []
    for i in range(len(dims) - 1):
        fan_in, fan_out = dims[i], dims[i + 1]
        key, kw, kb = jax.random.split(key, 3)
        s = 1.0 / float(fan_in) ** 0.5
        W = jax.random.uniform(kw, (fan_out, fan_in), jnp.float32, -s, s)
        b = jax.random.uniform(kb, (fan_out,), jnp.float32, -s, s)
        params.append((W, b))

    packed = pack_params(params)   # one-time packing, off the hot path

    # Small batch (latency path).
    key, kx = jax.random.split(key)
    x = jax.random.normal(kx, (batch, input_size), jnp.float32)
    out = jax.block_until_ready(meta_nn_forward(x, packed))
    ref = _reference_forward(x, params)
    assert out.shape == (batch, 1), out.shape
    assert jnp.allclose(out, ref, atol=1e-4, rtol=1e-4), "mismatch (batch=2)"

    # Also exercise the lane-dense (128-granule tile) path.
    key, kx2 = jax.random.split(key)
    x2 = jax.random.normal(kx2, (200, input_size), jnp.float32)
    out2 = jax.block_until_ready(meta_nn_forward(x2, packed))
    ref2 = _reference_forward(x2, params)
    assert out2.shape == (200, 1), out2.shape
    assert jnp.allclose(out2, ref2, atol=1e-4, rtol=1e-4), "mismatch (batch=200)"

    print("KERNEL_OK")
</pallas_src>

<mosaic_0001>
module attributes {stable_mosaic.version = 11 : i64} {
  func.func @_mlp_kernel(%arg0: i32, %arg1: memref<8x10xf32, #tpu.memory_space<vmem>>, %arg2: memref<10x128xf32, #tpu.memory_space<vmem>>, %arg3: memref<1x128xf32, #tpu.memory_space<vmem>>, %arg4: memref<4x128x128xf32, #tpu.memory_space<vmem>>, %arg5: memref<4x1x128xf32, #tpu.memory_space<vmem>>, %arg6: memref<8x128xf32, #tpu.memory_space<vmem>>, %arg7: memref<1x1xf32, #tpu.memory_space<vmem>>, %arg8: memref<1x8xf32, #tpu.memory_space<vmem>>) attributes {dimension_semantics = [#tpu.dimension_semantics<parallel>], iteration_bounds = array<i64: 1>, scalar_prefetch = 0 : i64, scratch_operands = 0 : i64, tpu.core_type = #tpu.core_type<tc>, window_params = [{transform_indices = @transform_0, window_bounds = array<i64: 8, 10>}, {pipeline_mode = #tpu.pipeline_mode<synchronous>, transform_indices = @transform_1, window_bounds = array<i64: 10, 128>}, {pipeline_mode = #tpu.pipeline_mode<synchronous>, transform_indices = @transform_2, window_bounds = array<i64: 1, 128>}, {pipeline_mode = #tpu.pipeline_mode<synchronous>, transform_indices = @transform_3, window_bounds = array<i64: 4, 128, 128>}, {pipeline_mode = #tpu.pipeline_mode<synchronous>, transform_indices = @transform_4, window_bounds = array<i64: 4, 1, 128>}, {pipeline_mode = #tpu.pipeline_mode<synchronous>, transform_indices = @transform_5, window_bounds = array<i64: 8, 128>}, {pipeline_mode = #tpu.pipeline_mode<synchronous>, transform_indices = @transform_6, window_bounds = array<i64: 1, 1>}, {transform_indices = @transform_7, window_bounds = array<i64: 1, 8>}]} {
    %c0 = arith.constant 0 : index
    %c0_0 = arith.constant 0 : index
    %0 = vector.load %arg1[%c0, %c0_0] : memref<8x10xf32, #tpu.memory_space<vmem>>, vector<8x10xf32>
    %c0_1 = arith.constant 0 : index
    %c0_2 = arith.constant 0 : index
    %1 = vector.load %arg2[%c0_1, %c0_2] : memref<10x128xf32, #tpu.memory_space<vmem>>, vector<10x128xf32>
    %cst = arith.constant dense<0.000000e+00> : vector<8x128xf32>
    %2 = tpu.matmul %0, %1, %cst {dimension_numbers = #tpu.dot_dimension_numbers<[1], [0], [0], [1], [0, 0, 1, 1], [], []>} : vector<8x10xf32>, vector<10x128xf32>, vector<8x128xf32> -> vector<8x128xf32>
    %c0_3 = arith.constant 0 : index
    %c0_4 = arith.constant 0 : index
    %3 = vector.load %arg3[%c0_3, %c0_4] : memref<1x128xf32, #tpu.memory_space<vmem>>, vector<1x128xf32>
    %4 = vector.broadcast %3 : vector<1x128xf32> to vector<8x128xf32>
    %5 = arith.addf %2, %4 : vector<8x128xf32>
    %cst_5 = arith.constant 0.000000e+00 : f32
    %6 = vector.broadcast %cst_5 : f32 to vector<8x128xf32>
    %7 = arith.maximumf %5, %6 : vector<8x128xf32>
    %c0_6 = arith.constant 0 : index
    %c0_7 = arith.constant 0 : index
    %c0_8 = arith.constant 0 : index
    %8 = vector.load %arg4[%c0_6, %c0_7, %c0_8] : memref<4x128x128xf32, #tpu.memory_space<vmem>>, vector<1x128x128xf32>
    %9 = vector.shape_cast %8 : vector<1x128x128xf32> to vector<128x128xf32>
    %cst_9 = arith.constant dense<0.000000e+00> : vector<8x128xf32>
    %10 = tpu.matmul %7, %9, %cst_9 {dimension_numbers = #tpu.dot_dimension_numbers<[1], [0], [0], [1], [0, 0, 1, 1], [], []>} : vector<8x128xf32>, vector<128x128xf32>, vector<8x128xf32> -> vector<8x128xf32>
    %c0_10 = arith.constant 0 : index
    %c0_11 = arith.constant 0 : index
    %c0_12 = arith.constant 0 : index
    %11 = vector.load %arg5[%c0_10, %c0_11, %c0_12] : memref<4x1x128xf32, #tpu.memory_space<vmem>>, vector<1x1x128xf32>
    %12 = vector.shape_cast %11 : vector<1x1x128xf32> to vector<1x128xf32>
    %13 = vector.broadcast %12 : vector<1x128xf32> to vector<8x128xf32>
    %14 = arith.addf %10, %13 : vector<8x128xf32>
    %cst_13 = arith.constant 0.000000e+00 : f32
    %15 = vector.broadcast %cst_13 : f32 to vector<8x128xf32>
    %16 = arith.maximumf %14, %15 : vector<8x128xf32>
    %c1 = arith.constant 1 : index
    %c0_14 = arith.constant 0 : index
    %c0_15 = arith.constant 0 : index
    %17 = vector.load %arg4[%c1, %c0_14, %c0_15] : memref<4x128x128xf32, #tpu.memory_space<vmem>>, vector<1x128x128xf32>
    %18 = vector.shape_cast %17 : vector<1x128x128xf32> to vector<128x128xf32>
    %cst_16 = arith.constant dense<0.000000e+00> : vector<8x128xf32>
    %19 = tpu.matmul %16, %18, %cst_16 {dimension_numbers = #tpu.dot_dimension_numbers<[1], [0], [0], [1], [0, 0, 1, 1], [], []>} : vector<8x128xf32>, vector<128x128xf32>, vector<8x128xf32> -> vector<8x128xf32>
    %c1_17 = arith.constant 1 : index
    %c0_18 = arith.constant 0 : index
    %c0_19 = arith.constant 0 : index
    %20 = vector.load %arg5[%c1_17, %c0_18, %c0_19] : memref<4x1x128xf32, #tpu.memory_space<vmem>>, vector<1x1x128xf32>
    %21 = vector.shape_cast %20 : vector<1x1x128xf32> to vector<1x128xf32>
    %22 = vector.broadcast %21 : vector<1x128xf32> to vector<8x128xf32>
    %23 = arith.addf %19, %22 : vector<8x128xf32>
    %cst_20 = arith.constant 0.000000e+00 : f32
    %24 = vector.broadcast %cst_20 : f32 to vector<8x128xf32>
    %25 = arith.maximumf %23, %24 : vector<8x128xf32>
    %c2 = arith.constant 2 : index
    %c0_21 = arith.constant 0 : index
    %c0_22 = arith.constant 0 : index
    %26 = vector.load %arg4[%c2, %c0_21, %c0_22] : memref<4x128x128xf32, #tpu.memory_space<vmem>>, vector<1x128x128xf32>
    %27 = vector.shape_cast %26 : vector<1x128x128xf32> to vector<128x128xf32>
    %cst_23 = arith.constant dense<0.000000e+00> : vector<8x128xf32>
    %28 = tpu.matmul %25, %27, %cst_23 {dimension_numbers = #tpu.dot_dimension_numbers<[1], [0], [0], [1], [0, 0, 1, 1], [], []>} : vector<8x128xf32>, vector<128x128xf32>, vector<8x128xf32> -> vector<8x128xf32>
    %c2_24 = arith.constant 2 : index
    %c0_25 = arith.constant 0 : index
    %c0_26 = arith.constant 0 : index
    %29 = vector.load %arg5[%c2_24, %c0_25, %c0_26] : memref<4x1x128xf32, #tpu.memory_space<vmem>>, vector<1x1x128xf32>
    %30 = vector.shape_cast %29 : vector<1x1x128xf32> to vector<1x128xf32>
    %31 = vector.broadcast %30 : vector<1x128xf32> to vector<8x128xf32>
    %32 = arith.addf %28, %31 : vector<8x128xf32>
    %cst_27 = arith.constant 0.000000e+00 : f32
    %33 = vector.broadcast %cst_27 : f32 to vector<8x128xf32>
    %34 = arith.maximumf %32, %33 : vector<8x128xf32>
    %c3 = arith.constant 3 : index
    %c0_28 = arith.constant 0 : index
    %c0_29 = arith.constant 0 : index
    %35 = vector.load %arg4[%c3, %c0_28, %c0_29] : memref<4x128x128xf32, #tpu.memory_space<vmem>>, vector<1x128x128xf32>
    %36 = vector.shape_cast %35 : vector<1x128x128xf32> to vector<128x128xf32>
    %cst_30 = arith.constant dense<0.000000e+00> : vector<8x128xf32>
    %37 = tpu.matmul %34, %36, %cst_30 {dimension_numbers = #tpu.dot_dimension_numbers<[1], [0], [0], [1], [0, 0, 1, 1], [], []>} : vector<8x128xf32>, vector<128x128xf32>, vector<8x128xf32> -> vector<8x128xf32>
    %c3_31 = arith.constant 3 : index
    %c0_32 = arith.constant 0 : index
    %c0_33 = arith.constant 0 : index
    %38 = vector.load %arg5[%c3_31, %c0_32, %c0_33] : memref<4x1x128xf32, #tpu.memory_space<vmem>>, vector<1x1x128xf32>
    %39 = vector.shape_cast %38 : vector<1x1x128xf32> to vector<1x128xf32>
    %40 = vector.broadcast %39 : vector<1x128xf32> to vector<8x128xf32>
    %41 = arith.addf %37, %40 : vector<8x128xf32>
    %cst_34 = arith.constant 0.000000e+00 : f32
    %42 = vector.broadcast %cst_34 : f32 to vector<8x128xf32>
    %43 = arith.maximumf %41, %42 : vector<8x128xf32>
    %c0_35 = arith.constant 0 : index
    %c0_36 = arith.constant 0 : index
    %44 = vector.load %arg6[%c0_35, %c0_36] : memref<8x128xf32, #tpu.memory_space<vmem>>, vector<8x128xf32>
    %cst_37 = arith.constant dense<0.000000e+00> : vector<8x8xf32>
    %45 = tpu.matmul %44, %43, %cst_37 {dimension_numbers = #tpu.dot_dimension_numbers<[1], [1], [0], [0], [0, 0, 1, 0], [], []>} : vector<8x128xf32>, vector<8x128xf32>, vector<8x8xf32> -> vector<8x8xf32>
    %46 = vector.extract_strided_slice %45 {offsets = [0, 0], sizes = [1, 8], strides = [1, 1]} : vector<8x8xf32> to vector<1x8xf32>
    %c0_38 = arith.constant 0 : index
    %c0_39 = arith.constant 0 : index
    %47 = vector.load %arg7[%c0_38, %c0_39] : memref<1x1xf32, #tpu.memory_space<vmem>>, vector<1x1xf32>
    %48 = vector.broadcast %47 : vector<1x1xf32> to vector<1x8xf32>
    %49 = arith.addf %46, %48 : vector<1x8xf32>
    %c0_40 = arith.constant 0 : index
    %c0_41 = arith.constant 0 : index
    %50 = vector.load %arg8[%c0_40, %c0_41] : memref<1x8xf32, #tpu.memory_space<vmem>>, vector<1x8xf32>
    tpu.vector_store %arg8[%c0_40, %c0_41], %49 {strides = array<i32>} : memref<1x8xf32, #tpu.memory_space<vmem>>, vector<1x8xf32>,
    return
  }
  func.func @transform_0(%arg0: i32) -> (i32, i32) {
    %c0_i32 = arith.constant 0 : i32
    %c0_i32_0 = arith.constant 0 : i32
    return %arg0, %c0_i32 : i32, i32
  }
  func.func @transform_1(%arg0: i32) -> (i32, i32) {
    %c0_i32 = arith.constant 0 : i32
    %c0_i32_0 = arith.constant 0 : i32
    %c0_i32_1 = arith.constant 0 : i32
    return %c0_i32, %c0_i32_0 : i32, i32
  }
  func.func @transform_2(%arg0: i32) -> (i32, i32) {
    %c0_i32 = arith.constant 0 : i32
    %c0_i32_0 = arith.constant 0 : i32
    %c0_i32_1 = arith.constant 0 : i32
    return %c0_i32, %c0_i32_0 : i32, i32
  }
  func.func @transform_3(%arg0: i32) -> (i32, i32, i32) {
    %c0_i32 = arith.constant 0 : i32
    %c0_i32_0 = arith.constant 0 : i32
    %c0_i32_1 = arith.constant 0 : i32
    %c0_i32_2 = arith.constant 0 : i32
    return %c0_i32, %c0_i32_0, %c0_i32_1 : i32, i32, i32
  }
  func.func @transform_4(%arg0: i32) -> (i32, i32, i32) {
    %c0_i32 = arith.constant 0 : i32
    %c0_i32_0 = arith.constant 0 : i32
    %c0_i32_1 = arith.constant 0 : i32
    %c0_i32_2 = arith.constant 0 : i32
    return %c0_i32, %c0_i32_0, %c0_i32_1 : i32, i32, i32
  }
  func.func @transform_5(%arg0: i32) -> (i32, i32) {
    %c0_i32 = arith.constant 0 : i32
    %c0_i32_0 = arith.constant 0 : i32
    %c0_i32_1 = arith.constant 0 : i32
    return %c0_i32, %c0_i32_0 : i32, i32
  }
  func.func @transform_6(%arg0: i32) -> (i32, i32) {
    %c0_i32 = arith.constant 0 : i32
    %c0_i32_0 = arith.constant 0 : i32
    %c0_i32_1 = arith.constant 0 : i32
    return %c0_i32, %c0_i32_0 : i32, i32
  }
  func.func @transform_7(%arg0: i32) -> (i32, i32) {
    %c0_i32 = arith.constant 0 : i32
    %c0_i32_0 = arith.constant 0 : i32
    return %c0_i32, %arg0 : i32, i32
  }
}

</mosaic_0001>

<bundles_post_ra>
// kernel: tpu_custom_call.1
= control target key start
LH: loop header
LB: loop body
LE: loop exit
PB: predicated region body
PF: predicated region fallthrough
CT: control target
= control target key end

     0   :  { %s1162_s0 = inlined_call_operand.hbm [shape: f32[8,10], index: 0, kind: input, shape index: {}]   ;;  %s1163_s1 = inlined_call_operand.hbm [shape: f32[10,128], index: 1, kind: input, shape index: {}]   ;;  %s1164_s2 = inlined_call_operand.vmem [shape: f32[1,128], index: 2, kind: input, shape index: {}]   ;;  %s1165_s3 = inlined_call_operand.hbm [shape: f32[4,128,128], index: 3, kind: input, shape index: {}]   ;;  %s1166_s4 = inlined_call_operand.hbm [shape: f32[4,1,128], index: 4, kind: input, shape index: {}]   ;;  %s1167_s5 = inlined_call_operand.vmem [shape: f32[8,128], index: 5, kind: input, shape index: {}]   ;;  %s1168_s6 = inlined_call_operand.<no memory space> [shape: f32[1,1], index: 6, kind: input, shape index: {}]   ;;  %s1169_s7 = inlined_call_operand.hbm [shape: f32[1,8], index: 7, kind: output, shape index: {}]  }
   0x1   :  { %v12_v0 = vstv %s1168_s6 }
   0x2   :  { %13 = vst [vmem:[#allocation2] sm:$0x1] %v12_v0 }
   0x3   :  { %14 = vsyncpa [#allocation4], 0 }
   0x4   :  { %15 = vsyncpa [#allocation7], 0 }
   0x5   :  { %16 = vsyncpa [#allocation10], 0 }
   0x6   :  { %17 = vsyncpa [#allocation5], 0  ;;  %s1007_s26 = smov [#allocation6]  }
   0x7   :  { %s33_s27 = sshll.u32 %s1007_s26, 4  ;;  %s34_s27 = int_to_ptr.vmem [resolvable:$true] %s33_s27 }
   0x8   :  { %s907_s28 = scalar_lea.vmem %s34_s27, 256  ;;  %p912_p1 = scmp.lt.s32.totalorder %s34_s27, %s34_s27 }
   0x9   :  { %p908_p0 = scmp.ne.s32.totalorder %s34_s27, %s907_s28  ;;  %p913_p2 = scmp.lt.s32.totalorder %s907_s28, %s907_s28 }
   0xb   :  { %p914_p3 = por %p913_p2, %p912_p1 }
   0xd   :  { %p915_p4 = pnand %p914_p3, %p908_p0 }
   0xf   :  { %918 = shalt.err (!%p915_p4)
}
  0x10   :  { %s1008_s29 = smov 128   ;;  %s1009_s30 = smov 8  }
  0x11   :  { %39 = dma.hbm_to_vmem [thread:$0]  %s1163_s1, 256, %s34_s27, [#allocation7], %s1008_s29, %s1008_s29, %s1009_s30  }
  0x12   :  { %s1010_s6 = smov [#allocation3]   ;;  %s1011_s11 = smov [#allocation8]  }
  0x13   :  { %s24_s10 = sshll.u32 %s1010_s6, 4  ;;  %s47_s12 = sshll.u32 %s1011_s11, 4  ;;  %s25_s10 = int_to_ptr.vmem [resolvable:$true] %s24_s10  ;;  %s48_s12 = int_to_ptr.vmem [resolvable:$true] %s47_s12 }
  0x14   :  { %s927_s13 = scalar_lea.vmem %s25_s10, 128  ;;  %p932_p6 = scmp.lt.s32.totalorder %s25_s10, %s25_s10 }
  0x15   :  { %p928_p5 = scmp.ne.s32.totalorder %s25_s10, %s927_s13  ;;  %p933_p7 = scmp.lt.s32.totalorder %s927_s13, %s927_s13 }
  0x17   :  { %p934_p8 = por %p933_p7, %p932_p6 }
  0x19   :  { %p935_p9 = pnand %p934_p8, %p928_p5 }
  0x1b   :  { %938 = shalt.err (!%p935_p9)
}
  0x1c   :  { %27 = dma.hbm_to_vmem [thread:$0]  %s1162_s0, 128, %s25_s10, [#allocation4]  }
  0x1d   :  { %s947_s16 = scalar_lea.vmem %s48_s12, 8192  ;;  %p952_p11 = scmp.lt.s32.totalorder %s48_s12, %s48_s12 }
  0x1e   :  { %p948_p10 = scmp.ne.s32.totalorder %s48_s12, %s947_s16  ;;  %p953_p12 = scmp.lt.s32.totalorder %s947_s16, %s947_s16 }
  0x20   :  { %p954_p13 = por %p953_p12, %p952_p11 }
  0x22   :  { %p955_p0 = pnand %p954_p13, %p948_p10 }
  0x24   :  { %958 = shalt.err (!%p955_p0)
}
  0x25   :  { %53 = dma.hbm_to_vmem [thread:$0]  %s1165_s3, 8192, %s48_s12, [#allocation7], %s1008_s29, %s1008_s29, %s1009_s30  }
  0x26   :  { %s1012_s18 = smov [#allocation9]  }
  0x27   :  { %s59_s19 = sshll.u32 %s1012_s18, 4  ;;  %s60_s19 = int_to_ptr.vmem [resolvable:$true] %s59_s19 }
  0x28   :  { %s967_s20 = scalar_lea.vmem %s60_s19, 64  ;;  %p972_p2 = scmp.lt.s32.totalorder %s60_s19, %s60_s19 }
  0x29   :  { %p968_p1 = scmp.ne.s32.totalorder %s60_s19, %s967_s20  ;;  %p973_p3 = scmp.lt.s32.totalorder %s967_s20, %s967_s20 }
  0x2b   :  { %p974_p4 = por %p973_p3, %p972_p2 }
  0x2d   :  { %p975_p5 = pnand %p974_p4, %p968_p1 }
  0x2f   :  { %978 = shalt.err (!%p975_p5)
}
  0x30   :  { %s1013_s0 = smov 16   ;;  %s1014_s21 = smov 1  }
  0x31   :  { %65 = dma.hbm_to_vmem [thread:$0]  %s1166_s4, 64, %s60_s19, [#allocation10], %s1013_s0, %s1013_s0, %s1014_s21  }
  0x32   :  { %999 = dma.done.wait [#allocation4], 128  }
  0x33   :  { %1000 = vsyncadd [#allocation4], 4294967168 }
  0x34   :  { %1001 = dma.done.wait [#allocation7], 8448  }
  0x35   :  { %1002 = vsyncadd [#allocation7], 4294958848 }
  0x36   :  { %1003 = dma.done.wait [#allocation10], 64  }
  0x37   :  { %1004 = vsyncadd [#allocation10], 4294967232  ;;  %v1015_v1 = vmov 0.0   ;;  %vm1016_vm0 = vmmov 0   ;;  %vm96_vm1 = vcmask 1041408   ;;  %v83_v3 = vld [vmem:[#allocation6] sm:$0xff] }
  0x38   :  { %734 = vmatprep.subr.mxu0 %v1015_v1  ;;  %738 = vmatprep.mubr.msk.f32.mxu0 %vm1016_vm0, %v1015_v1  ;;  %v84_v2 = vld [vmem:[#allocation6 + $0x8] sm:$0x3]  ;;  %v82_v4 = vld [vmem:[#allocation3] sm:$0xff]  ;;  %vm92_vm2 = vcmask 80896   ;;  %v185_v6 = vld [vmem:[#allocation8 + $0x70] sm:$0xff]  ;;  %s1018_s25 = smov [#allocation11]  }
  0x39   :  { %741 = vmatprep.subr.mxu1 %v1015_v1  ;;  %773 = vmatprep.mubr.msk.f32.mxu1 %vm1016_vm0, %v1015_v1  ;;  %v186_v5 = vld [vmem:[#allocation8 + $0x78] sm:$0xff]  ;;  %v184_v7 = vld [vmem:[#allocation8 + $0x68] sm:$0xff]  ;;  %v183_v8 = vld [vmem:[#allocation8 + $0x60] sm:$0xff]  ;;  %s643_s26 = sshll.u32 %s1018_s25, 4  ;;  %vm635_vm3 = vcmask 57344   ;;  %s644_s26 = int_to_ptr.vmem [resolvable:$true] %s643_s26 }
  0x3a   :  { %735 = vmatpush3.msk.msra.mxu0 %vm96_vm1, %v84_v2  ;;  %742 = vmatpush3.msra.mxu1 %v186_v5  ;;  %v182_v9 = vld [vmem:[#allocation8 + $0x58] sm:$0xff]  ;;  %v181_v10 = vld [vmem:[#allocation8 + $0x50] sm:$0xff]  ;;  %v180_v11 = vld [vmem:[#allocation8 + $0x48] sm:$0xff]  ;;  %s979_s27 = scalar_lea.vmem %s644_s26, 16  ;;  %s983_s28 = scalar_lea.vmem %s644_s26, 32 }
  0x3b   :  { %736 = vmatprep.subr.mxu0 %v1015_v1  ;;  %743 = vmatprep.subr.mxu1 %v1015_v1  ;;  %v179_v12 = vld [vmem:[#allocation8 + $0x40] sm:$0xff]  ;;  %v178_v13 = vld [vmem:[#allocation8 + $0x38] sm:$0xff]  ;;  %v177_v14 = vld [vmem:[#allocation8 + $0x30] sm:$0xff]  ;;  %p980_p6 = scmp.ne.s32.totalorder %s644_s26, %s979_s27  ;;  %p984_p7 = scmp.lt.s32.totalorder %s644_s26, %s644_s26 }
  0x3c   :  { %737 = vmatpush3.msra.mxu0 %v83_v3  ;;  %744 = vmatpush3.msra.mxu1 %v185_v6  ;;  %v176_v15 = vld [vmem:[#allocation8 + $0x28] sm:$0xff]  ;;  %v175_v16 = vld [vmem:[#allocation8 + $0x20] sm:$0xff]  ;;  %v174_v17 = vld [vmem:[#allocation8 + $0x18] sm:$0xff]  ;;  %p985_p8 = scmp.lt.s32.totalorder %s983_s28, %s979_s27 }
  0x3d   :  { %739 = vmatmul.mubr.msk.f32.vlgmr.msra.gmra.mxu0 %vm92_vm2, %v82_v4  ;;  %745 = vmatprep.subr.mxu1 %v1015_v1  ;;  %v173_v18 = vld [vmem:[#allocation8 + $0x10] sm:$0xff]  ;;  %v172_v19 = vld [vmem:[#allocation8 + $0x8] sm:$0xff]  ;;  %v171_v20 = vld [vmem:[#allocation8] sm:$0xff] }
  0x3e   :  { %776 = vmatprep.subr.mxu0 %v1015_v1  ;;  %746 = vmatpush3.msra.mxu1 %v184_v7  ;;  %v281_v21 = vld [vmem:[#allocation8 + $0xf8] sm:$0xff]  ;;  %v280_v22 = vld [vmem:[#allocation8 + $0xf0] sm:$0xff]  ;;  %v279_v23 = vld [vmem:[#allocation8 + $0xe8] sm:$0xff]  ;;  %p986_p9 = por %p985_p8, %p984_p7 }
  0x3f   :  { %808 = vmatprep.mubr.msk.f32.mxu0 %vm1016_vm0, %v1015_v1  ;;  %747 = vmatprep.subr.mxu1 %v1015_v1  ;;  %v278_v24 = vld [vmem:[#allocation8 + $0xe0] sm:$0xff]  ;;  %v277_v25 = vld [vmem:[#allocation8 + $0xd8] sm:$0xff]  ;;  %v276_v26 = vld [vmem:[#allocation8 + $0xd0] sm:$0xff] }
  0x40   :  { %748 = vmatpush3.msra.mxu1 %v183_v8  ;;  %777 = vmatpush3.msra.mxu0 %v281_v21  ;;  %v275_v27 = vld [vmem:[#allocation8 + $0xc8] sm:$0xff]  ;;  %v274_v28 = vld [vmem:[#allocation8 + $0xc0] sm:$0xff]  ;;  %v273_v29 = vld [vmem:[#allocation8 + $0xb8] sm:$0xff]  ;;  %p987_p10 = pnand %p986_p9, %p980_p6 }
  0x41   :  { %749 = vmatprep.subr.mxu1 %v1015_v1  ;;  %778 = vmatprep.subr.mxu0 %v1015_v1  ;;  %v272_v30 = vld [vmem:[#allocation8 + $0xb0] sm:$0xff]  ;;  %v271_v31 = vld [vmem:[#allocation8 + $0xa8] sm:$0xff]  ;;  %v270_v32 = vld [vmem:[#allocation8 + $0xa0] sm:$0xff] }
  0x42   :  { %750 = vmatpush3.msra.mxu1 %v182_v9  ;;  %779 = vmatpush3.msra.mxu0 %v280_v22  ;;  %v269_v33 = vld [vmem:[#allocation8 + $0x98] sm:$0xff]  ;;  %v654_v34 = vld [vmem:[%s1164_s2] ss:$0 sm:$0xff]  ;;  %v268_v39 = vld [vmem:[#allocation8 + $0x90] sm:$0xff] }
  0x43   :  { %751 = vmatprep.subr.mxu1 %v1015_v1  ;;  %780 = vmatprep.subr.mxu0 %v1015_v1  ;;  %v267_v40 = vld [vmem:[#allocation8 + $0x88] sm:$0xff]  ;;  %v266_v41 = vld [vmem:[#allocation8 + $0x80] sm:$0xff]  ;;  %v377_v42 = vld [vmem:[#allocation8 + $0x178] sm:$0xff] }
  0x44   :  { %752 = vmatpush3.msra.mxu1 %v181_v10  ;;  %781 = vmatpush3.msra.mxu0 %v279_v23  ;;  %v376_v43 = vld [vmem:[#allocation8 + $0x170] sm:$0xff]  ;;  %v375_v44 = vld [vmem:[#allocation8 + $0x168] sm:$0xff]  ;;  %v374_v45 = vld [vmem:[#allocation8 + $0x160] sm:$0xff] }
  0x45   :  { %753 = vmatprep.subr.mxu1 %v1015_v1  ;;  %782 = vmatprep.subr.mxu0 %v1015_v1  ;;  %v373_v46 = vld [vmem:[#allocation8 + $0x158] sm:$0xff]  ;;  %v372_v47 = vld [vmem:[#allocation8 + $0x150] sm:$0xff]  ;;  %v371_v48 = vld [vmem:[#allocation8 + $0x148] sm:$0xff] }
  0x46   :  { %754 = vmatpush3.msra.mxu1 %v180_v11  ;;  %783 = vmatpush3.msra.mxu0 %v278_v24  ;;  %v370_v49 = vld [vmem:[#allocation8 + $0x140] sm:$0xff]  ;;  %v369_v50 = vld [vmem:[#allocation8 + $0x138] sm:$0xff]  ;;  %v368_v51 = vld [vmem:[#allocation8 + $0x130] sm:$0xff] }
  0x47   :  { %755 = vmatprep.subr.mxu1 %v1015_v1  ;;  %784 = vmatprep.subr.mxu0 %v1015_v1  ;;  %v367_v52 = vld [vmem:[#allocation8 + $0x128] sm:$0xff]  ;;  %v366_v53 = vld [vmem:[#allocation8 + $0x120] sm:$0xff]  ;;  %v365_v54 = vld [vmem:[#allocation8 + $0x118] sm:$0xff] }
  0x48   :  { %756 = vmatpush3.msra.mxu1 %v179_v12  ;;  %785 = vmatpush3.msra.mxu0 %v277_v25  ;;  %v657_v55 = vld [vmem:[#allocation9] ss:$0 sm:$0xff]  ;;  %v364_v60 = vld [vmem:[#allocation8 + $0x110] sm:$0xff]  ;;  %v363_v61 = vld [vmem:[#allocation8 + $0x108] sm:$0xff] }
  0x49   :  { %757 = vmatprep.subr.mxu1 %v1015_v1  ;;  %786 = vmatprep.subr.mxu0 %v1015_v1  ;;  %v362_v62 = vld [vmem:[#allocation8 + $0x100] sm:$0xff]  ;;  %v473_v63 = vld [vmem:[#allocation8 + $0x1f8] sm:$0xff]  ;;  %v472_v0 = vld [vmem:[#allocation8 + $0x1f0] sm:$0xff] }
  0x4a   :  { %758 = vmatpush3.msra.mxu1 %v178_v13  ;;  %787 = vmatpush3.msra.mxu0 %v276_v26  ;;  %v471_v2 = vld [vmem:[#allocation8 + $0x1e8] sm:$0xff]  ;;  %v470_v3 = vld [vmem:[#allocation8 + $0x1e0] sm:$0xff]  ;;  %v469_v4 = vld [vmem:[#allocation8 + $0x1d8] sm:$0xff] }
  0x4b   :  { %759 = vmatprep.subr.mxu1 %v1015_v1  ;;  %788 = vmatprep.subr.mxu0 %v1015_v1  ;;  %v468_v5 = vld [vmem:[#allocation8 + $0x1d0] sm:$0xff]  ;;  %v467_v6 = vld [vmem:[#allocation8 + $0x1c8] sm:$0xff]  ;;  %v466_v7 = vld [vmem:[#allocation8 + $0x1c0] sm:$0xff] }
  0x4c   :  { %760 = vmatpush3.msra.mxu1 %v177_v14  ;;  %789 = vmatpush3.msra.mxu0 %v275_v27  ;;  %v465_v8 = vld [vmem:[#allocation8 + $0x1b8] sm:$0xff]  ;;  %v464_v9 = vld [vmem:[#allocation8 + $0x1b0] sm:$0xff]  ;;  %v463_v10 = vld [vmem:[#allocation8 + $0x1a8] sm:$0xff]  ;;  %v1017_v27 = vmov 0  }
  0x4d   :  { %761 = vmatprep.subr.mxu1 %v1015_v1  ;;  %790 = vmatprep.subr.mxu0 %v1015_v1  ;;  %v462_v11 = vld [vmem:[#allocation8 + $0x1a0] sm:$0xff]  ;;  %v461_v12 = vld [vmem:[#allocation8 + $0x198] sm:$0xff] }
  0x4e   :  { %762 = vmatpush3.msra.mxu1 %v176_v15  ;;  %791 = vmatpush3.msra.mxu0 %v274_v28  ;;  %v658_v13 = vld [vmem:[#allocation9 + $0x1] ss:$0 sm:$0xff]  ;;  %v659_v21 = vld [vmem:[#allocation9 + $0x2] ss:$0 sm:$0xff]  ;;  %v624_v26 = vld [vmem:[#allocation2] sm:$0x1] }
  0x4f   :  { %763 = vmatprep.subr.mxu1 %v1015_v1  ;;  %792 = vmatprep.subr.mxu0 %v1015_v1  ;;  %v660_v28 = vld [vmem:[#allocation9 + $0x3] ss:$0 sm:$0xff] }
  0x50   :  { %764 = vmatpush3.msra.mxu1 %v175_v16  ;;  %793 = vmatpush3.msra.mxu0 %v273_v29 }
  0x51   :  { %765 = vmatprep.subr.mxu1 %v1015_v1  ;;  %794 = vmatprep.subr.mxu0 %v1015_v1 }
  0x52   :  { %766 = vmatpush3.msra.mxu1 %v174_v17  ;;  %795 = vmatpush3.msra.mxu0 %v272_v30 }
  0x53   :  { %767 = vmatprep.subr.mxu1 %v1015_v1  ;;  %796 = vmatprep.subr.mxu0 %v1015_v1 }
  0x54   :  { %768 = vmatpush3.msra.mxu1 %v173_v18  ;;  %797 = vmatpush3.msra.mxu0 %v271_v31  ;;  %v460_v18 = vld [vmem:[#allocation8 + $0x190] sm:$0xff] }
  0x55   :  { %769 = vmatprep.subr.mxu1 %v1015_v1  ;;  %798 = vmatprep.subr.mxu0 %v1015_v1 }
  0x56   :  { %770 = vmatpush3.msra.mxu1 %v172_v19  ;;  %799 = vmatpush3.msra.mxu0 %v270_v32  ;;  %v459_v19 = vld [vmem:[#allocation8 + $0x188] sm:$0xff] }
  0x57   :  { %771 = vmatprep.subr.mxu1 %v1015_v1  ;;  %800 = vmatprep.subr.mxu0 %v1015_v1 }
  0x58   :  { %772 = vmatpush3.msra.mxu1 %v171_v20  ;;  %801 = vmatpush3.msra.mxu0 %v269_v33  ;;  %v458_v20 = vld [vmem:[#allocation8 + $0x180] sm:$0xff]  ;;  %v630_v33 = vlaneseq }
  0x59   :  { %811 = vmatprep.subr.mxu1 %v1015_v1  ;;  %802 = vmatprep.subr.mxu0 %v1015_v1 }
  0x5a   :  { %803 = vmatpush3.msra.mxu0 %v268_v39  ;;  %898 = vset.pattern.permute.xlu0 %v1017_v27 }
  0x5b   :  { %804 = vmatprep.subr.mxu0 %v1015_v1  ;;  %627 = vperm.xlu0 %898, %v624_v26  }
  0x5c   :  { %805 = vmatpush3.msra.mxu0 %v267_v40 }
  0x5d   :  { %806 = vmatprep.subr.mxu0 %v1015_v1 }
  0x5e   :  { %807 = vmatpush3.msra.mxu0 %v266_v41 }
  0x5f   :  { %846 = vmatprep.subr.mxu0 %v1015_v1 }
  0xfd   :  { %v166_v35 = vpop.f32.mrf.mxu0 }
  0xfe   :  { %v167_v36 = vadd.f32 %v654_v34, %v166_v35  ;;  %v631_v34 = vshrl.u32 %v630_v33, 7 }
  0xff   :  { %v740_v37 = vpop.f32.mrf.mxu0 }
 0x100   :  { %v170_v38 = vmax.f32 %v167_v36, 0.0  ;;  %v632_v35 = vsub.s32 0, %v631_v34  ;;  %v628_v36 = vpop.permute.xlu0 %627 }
 0x102   :  { %774 = vmatmul.mubr.f32.vlgmr.msra.gmra.mxu1 %v170_v38  ;;  %v633_v37 = vrot.slane %v628_v36, %v632_v35 }
 0x103   :  { %843 = vmatprep.mubr.msk.f32.mxu1 %vm1016_vm0, %v1015_v1  ;;  %812 = vmatpush3.msra.mxu1 %v377_v42 }
 0x104   :  { %813 = vmatprep.subr.mxu1 %v1015_v1 }
 0x105   :  { %814 = vmatpush3.msra.mxu1 %v376_v43 }
 0x106   :  { %815 = vmatprep.subr.mxu1 %v1015_v1 }
 0x107   :  { %816 = vmatpush3.msra.mxu1 %v375_v44 }
 0x108   :  { %817 = vmatprep.subr.mxu1 %v1015_v1 }
 0x109   :  { %818 = vmatpush3.msra.mxu1 %v374_v45 }
 0x10a   :  { %819 = vmatprep.subr.mxu1 %v1015_v1 }
 0x10b   :  { %820 = vmatpush3.msra.mxu1 %v373_v46 }
 0x10c   :  { %821 = vmatprep.subr.mxu1 %v1015_v1 }
 0x10d   :  { %822 = vmatpush3.msra.mxu1 %v372_v47 }
 0x10e   :  { %823 = vmatprep.subr.mxu1 %v1015_v1 }
 0x10f   :  { %824 = vmatpush3.msra.mxu1 %v371_v48 }
 0x110   :  { %825 = vmatprep.subr.mxu1 %v1015_v1 }
 0x111   :  { %826 = vmatpush3.msra.mxu1 %v370_v49 }
 0x112   :  { %827 = vmatprep.subr.mxu1 %v1015_v1 }
 0x113   :  { %828 = vmatpush3.msra.mxu1 %v369_v50 }
 0x114   :  { %829 = vmatprep.subr.mxu1 %v1015_v1 }
 0x115   :  { %830 = vmatpush3.msra.mxu1 %v368_v51 }
 0x116   :  { %831 = vmatprep.subr.mxu1 %v1015_v1 }
 0x117   :  { %832 = vmatpush3.msra.mxu1 %v367_v52 }
 0x118   :  { %833 = vmatprep.subr.mxu1 %v1015_v1 }
 0x119   :  { %834 = vmatpush3.msra.mxu1 %v366_v53 }
 0x11a   :  { %835 = vmatprep.subr.mxu1 %v1015_v1 }
 0x11b   :  { %836 = vmatpush3.msra.mxu1 %v365_v54 }
 0x11c   :  { %837 = vmatprep.subr.mxu1 %v1015_v1 }
 0x11d   :  { %838 = vmatpush3.msra.mxu1 %v364_v60 }
 0x11e   :  { %839 = vmatprep.subr.mxu1 %v1015_v1 }
 0x11f   :  { %840 = vmatpush3.msra.mxu1 %v363_v61 }
 0x120   :  { %841 = vmatprep.subr.mxu1 %v1015_v1 }
 0x121   :  { %842 = vmatpush3.msra.mxu1 %v362_v62 }
 0x122   :  { %881 = vmatprep.subr.mxu1 %v1015_v1 }
 0x1c2   :  { %v260_v56 = vpop.f32.mrf.mxu1 }
 0x1c3   :  { %v261_v57 = vadd.f32 %v657_v55, %v260_v56 }
 0x1c4   :  { %v775_v58 = vpop.f32.mrf.mxu1 }
 0x1c5   :  { %v264_v59 = vmax.f32 %v261_v57, 0.0 }
 0x1c7   :  { %809 = vmatmul.mubr.f32.vlgmr.msra.gmra.mxu0 %v264_v59 }
 0x1c8   :  { %878 = vmatprep.mubr.msk.f32.mxu0 %vm1016_vm0, %v1015_v1  ;;  %847 = vmatpush3.msra.mxu0 %v473_v63 }
 0x1c9   :  { %848 = vmatprep.subr.mxu0 %v1015_v1 }
 0x1ca   :  { %849 = vmatpush3.msra.mxu0 %v472_v0 }
 0x1cb   :  { %850 = vmatprep.subr.mxu0 %v1015_v1 }
 0x1cc   :  { %851 = vmatpush3.msra.mxu0 %v471_v2 }
 0x1cd   :  { %852 = vmatprep.subr.mxu0 %v1015_v1 }
 0x1ce   :  { %853 = vmatpush3.msra.mxu0 %v470_v3 }
 0x1cf   :  { %854 = vmatprep.subr.mxu0 %v1015_v1 }
 0x1d0   :  { %855 = vmatpush3.msra.mxu0 %v469_v4 }
 0x1d1   :  { %856 = vmatprep.subr.mxu0 %v1015_v1 }
 0x1d2   :  { %857 = vmatpush3.msra.mxu0 %v468_v5 }
 0x1d3   :  { %858 = vmatprep.subr.mxu0 %v1015_v1 }
 0x1d4   :  { %859 = vmatpush3.msra.mxu0 %v467_v6 }
 0x1d5   :  { %860 = vmatprep.subr.mxu0 %v1015_v1 }
 0x1d6   :  { %861 = vmatpush3.msra.mxu0 %v466_v7 }
 0x1d7   :  { %862 = vmatprep.subr.mxu0 %v1015_v1 }
 0x1d8   :  { %863 = vmatpush3.msra.mxu0 %v465_v8 }
 0x1d9   :  { %864 = vmatprep.subr.mxu0 %v1015_v1 }
 0x1da   :  { %865 = vmatpush3.msra.mxu0 %v464_v9 }
 0x1db   :  { %866 = vmatprep.subr.mxu0 %v1015_v1 }
 0x1dc   :  { %867 = vmatpush3.msra.mxu0 %v463_v10 }
 0x1dd   :  { %868 = vmatprep.subr.mxu0 %v1015_v1 }
 0x1de   :  { %869 = vmatpush3.msra.mxu0 %v462_v11 }
 0x1df   :  { %870 = vmatprep.subr.mxu0 %v1015_v1 }
 0x1e0   :  { %871 = vmatpush3.msra.mxu0 %v461_v12 }
 0x1e1   :  { %872 = vmatprep.subr.mxu0 %v1015_v1 }
 0x1e2   :  { %873 = vmatpush3.msra.mxu0 %v460_v18 }
 0x1e3   :  { %874 = vmatprep.subr.mxu0 %v1015_v1 }
 0x1e4   :  { %875 = vmatpush3.msra.mxu0 %v459_v19 }
 0x1e5   :  { %876 = vmatprep.subr.mxu0 %v1015_v1 }
 0x1e6   :  { %877 = vmatpush3.msra.mxu0 %v458_v20 }
 0x287   :  { %v356_v14 = vpop.f32.mrf.mxu0 }
 0x288   :  { %v357_v15 = vadd.f32 %v658_v13, %v356_v14 }
 0x289   :  { %v810_v16 = vpop.f32.mrf.mxu0 }
 0x28a   :  { %v360_v17 = vmax.f32 %v357_v15, 0.0 }
 0x28c   :  { %844 = vmatmul.mubr.f32.vlgmr.msra.gmra.mxu1 %v360_v17 }
 0x28d   :  { %883 = vmatprep.mubr.msk.f32.mxu1 %vm1016_vm0, %v1015_v1  ;;  %v553_v1 = vld [vmem:[%s1167_s5] sm:$0xff] }
 0x34c   :  { %v452_v22 = vpop.f32.mrf.mxu1 }
 0x34d   :  { %v453_v23 = vadd.f32 %v659_v21, %v452_v22 }
 0x34e   :  { %v845_v24 = vpop.f32.mrf.mxu1 }
 0x34f   :  { %v456_v25 = vmax.f32 %v453_v23, 0.0 }
 0x351   :  { %879 = vmatmul.mubr.f32.vlgmr.msra.gmra.mxu0 %v456_v25 }
 0x411   :  { %v548_v29 = vpop.f32.mrf.mxu0 }
 0x412   :  { %v549_v30 = vadd.f32 %v660_v28, %v548_v29 }
 0x413   :  { %v880_v31 = vpop.f32.mrf.mxu0 }
 0x414   :  { %v552_v32 = vmax.f32 %v549_v30, 0.0 }
 0x416   :  { %882 = vmatpush3.xpose.msra.mxu1 %v552_v32 }
 0x419   :  { %884 = vmatmul.mubr.f32.vlgmr.msra.gmra.mxu1 %v553_v1 }
 0x4d9   :  { %v620_v38 = vpop.f32.mrf.mxu1 }
 0x4da   :  { %v634_v39 = vadd.f32 %v633_v37, %v620_v38 }
 0x4db   :  { %v885_v40 = vpop.f32.mrf.mxu1 }
 0x4dc   :  { %636 = vst.msk [vmem:[#allocation11] sm:$0x1] %vm635_vm3, %v634_v39 }
 0x4dd   :  { %990 = shalt.err (!%p987_p10)
}
 0x4de   :  { %646 = dma.vmem_to_hbm [thread:$0]  %s644_s26, 16, %s1169_s7, [#allocation5]  }
 0x4df   :  { %1005 = dma.done.wait [#allocation5], 16  }
 0x4e0   :  { %1006 = vsyncadd [#allocation5], 4294967280 }
 0x4e1   :  { %650 = vsyncpa [#allocation4], 1 }
 0x4e2   :  { %651 = vsyncpa [#allocation7], 1 }
 0x4e3   :  { %652 = vsyncpa [#allocation10], 1 }
 0x4e4   :  { %653 = vsyncpa [#allocation5], 1 }

</bundles_post_ra>
